<compile_context>
chip_gen: v5e
topology: v5e:2x2
jax: 0.10.0
libtpu: 0.0.40
codegen_flags: <defaults>
</compile_context>

<pallas_src>
import functools
import math

import jax
import jax.numpy as jnp
from jax import lax
from jax.experimental import pallas as pl
from jax.experimental.pallas import tpu as pltpu


def _layernorm(x, g, b, eps=1e-5):
    x = x.astype(jnp.float32)
    mu = jnp.mean(x, axis=-1, keepdims=True)
    var = jnp.mean((x - mu) ** 2, axis=-1, keepdims=True)
    return (x - mu) * lax.rsqrt(var + eps) * g + b


def _gelu_exact(x):
    # matches torch.nn.GELU() (erf-based, non-approximate)
    return 0.5 * x * (1.0 + lax.erf(x * (1.0 / math.sqrt(2.0))))


def _balanced_tile(s, n_tiles):
    # Bijection pairing light & heavy causal q-tiles: 0, n-1, 1, n-2, ...
    # (pure int arithmetic so it is usable both in index_maps and in the kernel)
    r = s % 2
    return r * (n_tiles - 1) + (1 - 2 * r) * (s // 2)


# --------------------------------------------------------------------------
# Kernel 1: LN1 + fused QKV projection, emits head-split q/k/v (bf16)
# --------------------------------------------------------------------------
def qkv_kernel(x_ref, ln1_g_ref, ln1_b_ref, w_attn_ref, b_attn_ref,
               q_ref, k_ref, v_ref, *, n_head, head_dim):
    x = x_ref[0]                                   # (TQ, C) f32
    C = x.shape[-1]
    h = _layernorm(x, ln1_g_ref[0], ln1_b_ref[0])
    # bf16 MXU inputs, fp32 accumulation
    qkv = jnp.dot(h.astype(jnp.bfloat16), w_attn_ref[...],
                  preferred_element_type=jnp.float32) + b_attn_ref[0]   # (TQ, 3C) f32
    qkv = qkv.astype(jnp.bfloat16)                 # single cast; bf16 stores below
    for hi in range(n_head):                       # static per-head slice stores
        lo = hi * head_dim
        q_ref[0, hi] = qkv[:, lo:lo + head_dim]
        k_ref[0, hi] = qkv[:, C + lo:C + lo + head_dim]
        v_ref[0, hi] = qkv[:, 2 * C + lo:2 * C + lo + head_dim]


# --------------------------------------------------------------------------
# Kernel 2: per-head flash attention (causal) + proj + residual + LN2 + MLP
# --------------------------------------------------------------------------
def attn_mlp_kernel(x_ref, q_ref, k_ref, v_ref,
                    w_proj_ref, b_proj_ref,
                    ln2_g_ref, ln2_b_ref,
                    w_fc_ref, b_fc_ref, w_out_ref, b_out_ref,
                    o_ref, *, n_head, head_dim, tq, tk, n_q_tiles, balance):
    s_idx = pl.program_id(1)
    qi = _balanced_tile(s_idx, n_q_tiles) if balance else s_idx  # actual q-tile index

    x = x_ref[0]                                   # (TQ, C) f32
    C = x.shape[-1]
    scale = 1.0 / math.sqrt(head_dim)

    # Diagonal-tile causal mask (valid because tk == tq): local_row >= local_col.
    diag_mask = (lax.broadcasted_iota(jnp.int32, (tq, tk), 0)
                 >= lax.broadcasted_iota(jnp.int32, (tq, tk), 1))

    dn = (((1,), (1,)), ((), ()))                  # contract last dims: q @ k^T

    head_outs = []
    for hi in range(n_head):                       # static head loop -> small vreg carry
        q_h = q_ref[0, hi]                         # (TQ, hd) bf16

        def kv_step(j, carry):
            m, l, acc = carry
            start = pl.multiple_of(j * tk, tk)
            k_blk = k_ref[0, hi, pl.ds(start, tk), :]          # (TK, hd) bf16
            v_blk = v_ref[0, hi, pl.ds(start, tk), :]
            s = lax.dot_general(q_h, k_blk, dn,
                                preferred_element_type=jnp.float32) * scale   # (TQ, TK)
            m_new = jnp.maximum(m, jnp.max(s, axis=-1, keepdims=True))
            alpha = jnp.exp(m - m_new)
            p = jnp.exp(s - m_new)
            l_new = alpha * l + jnp.sum(p, axis=-1, keepdims=True)
            acc_new = alpha * acc + jnp.dot(p.astype(jnp.bfloat16), v_blk,
                                            preferred_element_type=jnp.float32)
            return m_new, l_new, acc_new

        m0 = jnp.full((tq, 1), -jnp.inf, jnp.float32)
        l0 = jnp.zeros((tq, 1), jnp.float32)
        a0 = jnp.zeros((tq, head_dim), jnp.float32)

        # Fully-unmasked KV tiles: j in [0, qi)  (no compare/select/exp of -inf lanes).
        m, l, acc = lax.fori_loop(0, qi, kv_step, (m0, l0, a0))

        # Diagonal tile j == qi: the only tile that needs masking.
        start = pl.multiple_of(qi * tk, tk)
        k_blk = k_ref[0, hi, pl.ds(start, tk), :]
        v_blk = v_ref[0, hi, pl.ds(start, tk), :]
        s = lax.dot_general(q_h, k_blk, dn,
                            preferred_element_type=jnp.float32) * scale
        s = jnp.where(diag_mask, s, -jnp.inf)
        m_new = jnp.maximum(m, jnp.max(s, axis=-1, keepdims=True))
        alpha = jnp.exp(m - m_new)
        p = jnp.exp(s - m_new)
        l = alpha * l + jnp.sum(p, axis=-1, keepdims=True)
        acc = alpha * acc + jnp.dot(p.astype(jnp.bfloat16), v_blk,
                                    preferred_element_type=jnp.float32)

        inv_l = pl.reciprocal(l, approx=True)
        head_outs.append((acc * inv_l).astype(jnp.bfloat16))   # (TQ, hd)

    # Head concat (lane concat, once per tile) + single K=C output projection.
    y = jnp.concatenate(head_outs, axis=-1)        # (TQ, C) bf16
    attn_out = jnp.dot(y, w_proj_ref[...],
                       preferred_element_type=jnp.float32) + b_proj_ref[0]

    x1 = x + attn_out                              # residual (attn/resid dropout = identity)

    # ---------------- MLP branch ----------------
    h2 = _layernorm(x1, ln2_g_ref[0], ln2_b_ref[0])
    hfc = jnp.dot(h2.astype(jnp.bfloat16), w_fc_ref[...],
                  preferred_element_type=jnp.float32) + b_fc_ref[0]
    hfc = _gelu_exact(hfc)
    mlp_out = jnp.dot(hfc.astype(jnp.bfloat16), w_out_ref[...],
                      preferred_element_type=jnp.float32) + b_out_ref[0]

    o_ref[0] = (x1 + mlp_out).astype(o_ref.dtype)


# --------------------------------------------------------------------------
# Wrapper
# --------------------------------------------------------------------------
def _default_vmem_limit_bytes():
    mib = 1024 * 1024
    try:
        cap = pltpu.get_tpu_info().vmem_capacity_bytes
    except Exception:
        cap = 128 * mib
    # leave headroom for pipeline internals; v7x (64 MiB) -> 48 MiB, v5e/v6e -> 112 MiB
    return int(max(32 * mib, min(cap - 16 * mib, 112 * mib)))


def block_forward(x, params, n_head, *, seq_tile=None, vmem_limit_bytes=None,
                  balance_causal=True):
    B, T, C = x.shape
    assert C % n_head == 0
    head_dim = C // n_head

    tq = seq_tile if seq_tile is not None else min(T, 128)
    assert T % tq == 0
    tk = tq                 # diagonal-tile causal logic requires tk == tq
    assert tk == tq
    n_q_tiles = T // tq
    balance = bool(balance_causal and n_q_tiles > 1)

    if vmem_limit_bytes is None:
        vmem_limit_bytes = _default_vmem_limit_bytes()

    f32, bf16 = jnp.float32, jnp.bfloat16
    ln1_g = params["ln1_g"].astype(f32)
    ln1_b = params["ln1_b"].astype(f32)
    ln2_g = params["ln2_g"].astype(f32)
    ln2_b = params["ln2_b"].astype(f32)
    w_attn = params["w_attn"].astype(bf16)
    b_attn = params["b_attn"].astype(f32)
    w_proj = params["w_proj"].astype(bf16)        # (C, C): single K=C projection matmul
    b_proj = params["b_proj"].astype(f32)
    w_fc = params["w_fc"].astype(bf16)
    b_fc = params["b_fc"].astype(f32)
    w_out = params["w_out"].astype(bf16)
    b_out = params["b_out"].astype(f32)

    single_buf = pl.Buffered(1)   # resident blocks: no double buffering

    def const_spec(p):
        nd = len(p.shape)
        return pl.BlockSpec(p.shape, lambda b, s, _n=nd: (0,) * _n,
                            pipeline_mode=single_buf)

    cparams = pltpu.CompilerParams(
        dimension_semantics=("parallel", "parallel"),
        vmem_limit_bytes=vmem_limit_bytes)

    # q-tile remap for causal load balancing (folded into pass-2 index_maps).
    remap = (lambda s: _balanced_tile(s, n_q_tiles)) if balance else (lambda s: s)

    row_spec = pl.BlockSpec((1, tq, C), lambda b, s: (b, s, 0))
    row_spec_bal = pl.BlockSpec((1, tq, C), lambda b, s: (b, remap(s), 0))
    hs_tile = pl.BlockSpec((1, n_head, tq, head_dim), lambda b, s: (b, 0, s, 0))
    hs_tile_bal = pl.BlockSpec((1, n_head, tq, head_dim),
                               lambda b, s: (b, 0, remap(s), 0))
    hs_full = pl.BlockSpec((1, n_head, T, head_dim), lambda b, s: (b, 0, 0, 0),
                           pipeline_mode=single_buf)   # changes only with b

    # ---- pass 1: LN1 + QKV projection -> head-split q/k/v (bf16) ----
    q, k, v = pl.pallas_call(
        functools.partial(qkv_kernel, n_head=n_head, head_dim=head_dim),
        grid=(B, n_q_tiles),
        in_specs=[row_spec,
                  const_spec(ln1_g), const_spec(ln1_b),
                  const_spec(w_attn), const_spec(b_attn)],
        out_specs=(hs_tile, hs_tile, hs_tile),
        out_shape=(jax.ShapeDtypeStruct((B, n_head, T, head_dim), bf16),) * 3,
        compiler_params=cparams,
    )(x, ln1_g, ln1_b, w_attn, b_attn)

    # ---- pass 2: flash attention + proj + residual + LN2 + MLP + residual ----
    out = pl.pallas_call(
        functools.partial(attn_mlp_kernel, n_head=n_head, head_dim=head_dim,
                          tq=tq, tk=tk, n_q_tiles=n_q_tiles, balance=balance),
        grid=(B, n_q_tiles),
        in_specs=[row_spec_bal,        # x tile (fp32, residual)
                  hs_tile_bal,         # q tile
                  hs_full,             # k (full sequence for this batch element)
                  hs_full,             # v
                  const_spec(w_proj), const_spec(b_proj),
                  const_spec(ln2_g), const_spec(ln2_b),
                  const_spec(w_fc), const_spec(b_fc),
                  const_spec(w_out), const_spec(b_out)],
        out_specs=row_spec_bal,
        out_shape=jax.ShapeDtypeStruct((B, T, C), f32),
        compiler_params=cparams,
    )(x, q, k, v, w_proj, b_proj, ln2_g, ln2_b, w_fc, b_fc, w_out, b_out)

    return out


# ---------------- pure-JAX reference for verification ----------------
def block_reference(x, params, n_head):
    B, T, C = x.shape
    hd = C // n_head

    def ln(z, g, b):
        mu = jnp.mean(z, axis=-1, keepdims=True)
        var = jnp.mean((z - mu) ** 2, axis=-1, keepdims=True)
        return (z - mu) / jnp.sqrt(var + 1e-5) * g + b

    h = ln(x, params["ln1_g"][0], params["ln1_b"][0])
    qkv = h @ params["w_attn"] + params["b_attn"][0]
    q, k, v = jnp.split(qkv, 3, axis=-1)
    q = q.reshape(B, T, n_head, hd).transpose(0, 2, 1, 3)
    k = k.reshape(B, T, n_head, hd).transpose(0, 2, 1, 3)
    v = v.reshape(B, T, n_head, hd).transpose(0, 2, 1, 3)
    att = (q @ jnp.swapaxes(k, -2, -1)) / math.sqrt(hd)
    mask = jnp.tril(jnp.ones((T, T), dtype=bool))
    att = jnp.where(mask[None, None], att, -jnp.inf)
    att = jax.nn.softmax(att, axis=-1)
    y = (att @ v).transpose(0, 2, 1, 3).reshape(B, T, C)
    y = y @ params["w_proj"] + params["b_proj"][0]
    x1 = x + y
    h2 = ln(x1, params["ln2_g"][0], params["ln2_b"][0])
    hfc = h2 @ params["w_fc"] + params["b_fc"][0]
    hfc = 0.5 * hfc * (1.0 + lax.erf(hfc / math.sqrt(2.0)))
    return x1 + hfc @ params["w_out"] + params["b_out"][0]


def _make_params(key, C):
    ks = jax.random.split(key, 4)

    def bf16_round(w):          # store weights exactly representable in bf16
        return w.astype(jnp.bfloat16).astype(jnp.float32)

    return {
        "ln1_g": jnp.ones((1, C), jnp.float32),
        "ln1_b": jnp.zeros((1, C), jnp.float32),
        "w_attn": bf16_round(0.02 * jax.random.normal(ks[0], (C, 3 * C), jnp.float32)),
        "b_attn": jnp.zeros((1, 3 * C), jnp.float32),
        "w_proj": bf16_round(0.02 * jax.random.normal(ks[1], (C, C), jnp.float32)),
        "b_proj": jnp.zeros((1, C), jnp.float32),
        "ln2_g": jnp.ones((1, C), jnp.float32),
        "ln2_b": jnp.zeros((1, C), jnp.float32),
        "w_fc": bf16_round(0.02 * jax.random.normal(ks[2], (C, 4 * C), jnp.float32)),
        "b_fc": jnp.zeros((1, 4 * C), jnp.float32),
        "w_out": bf16_round(0.02 * jax.random.normal(ks[3], (4 * C, C), jnp.float32)),
        "b_out": jnp.zeros((1, C), jnp.float32),
    }


if __name__ == "__main__":
    key = jax.random.PRNGKey(0)
    k_param, k_x1, k_x2 = jax.random.split(key, 3)

    # NOTE: production shapes should keep C a multiple of 128 and seq_tile a multiple
    # of 8 (the (8,128) rule); these small test shapes pass because block dims equal
    # full array dims.

    # Test 1: single q-tile path (diagonal tile only).
    B, T, C, n_head = 2, 8, 32, 4
    params = _make_params(k_param, C)
    x = jax.random.normal(k_x1, (B, T, C), jnp.float32)
    out = jax.block_until_ready(block_forward(x, params, n_head))
    ref = block_reference(x, params, n_head)
    assert out.shape == (B, T, C)
    err = float(jnp.max(jnp.abs(out - ref)))
    assert jnp.allclose(out, ref, atol=2e-2, rtol=2e-2), f"mismatch (max abs err {err})"

    # Test 2: multi q-tile path (unmasked-tile fori_loop + balanced tile remap).
    T2 = 32
    x2 = jax.random.normal(k_x2, (B, T2, C), jnp.float32)
    out2 = jax.block_until_ready(block_forward(x2, params, n_head, seq_tile=8))
    ref2 = block_reference(x2, params, n_head)
    assert out2.shape == (B, T2, C)
    err2 = float(jnp.max(jnp.abs(out2 - ref2)))
    assert jnp.allclose(out2, ref2, atol=2e-2, rtol=2e-2), f"mismatch (max abs err {err2})"

    print("KERNEL_OK")
</pallas_src>

<mosaic_0001>
module attributes {stable_mosaic.version = 11 : i64} {
  func.func @qkv_kernel(%arg0: i32, %arg1: i32, %arg2: memref<1x8x32xf32, #tpu.memory_space<vmem>>, %arg3: memref<1x32xf32, #tpu.memory_space<vmem>>, %arg4: memref<1x32xf32, #tpu.memory_space<vmem>>, %arg5: memref<32x96xbf16, #tpu.memory_space<vmem>>, %arg6: memref<1x96xf32, #tpu.memory_space<vmem>>, %arg7: memref<1x4x8x8xbf16, #tpu.memory_space<vmem>>, %arg8: memref<1x4x8x8xbf16, #tpu.memory_space<vmem>>, %arg9: memref<1x4x8x8xbf16, #tpu.memory_space<vmem>>) attributes {dimension_semantics = [#tpu.dimension_semantics<parallel>, #tpu.dimension_semantics<parallel>], iteration_bounds = array<i64: 2, 1>, scalar_prefetch = 0 : i64, scratch_operands = 0 : i64, tpu.core_type = #tpu.core_type<tc>, window_params = [{transform_indices = @transform_0, window_bounds = array<i64: 1, 8, 32>}, {pipeline_mode = #tpu.pipeline_mode<synchronous>, transform_indices = @transform_1, window_bounds = array<i64: 1, 32>}, {pipeline_mode = #tpu.pipeline_mode<synchronous>, transform_indices = @transform_2, window_bounds = array<i64: 1, 32>}, {pipeline_mode = #tpu.pipeline_mode<synchronous>, transform_indices = @transform_3, window_bounds = array<i64: 32, 96>}, {pipeline_mode = #tpu.pipeline_mode<synchronous>, transform_indices = @transform_4, window_bounds = array<i64: 1, 96>}, {transform_indices = @transform_5, window_bounds = array<i64: 1, 4, 8, 8>}, {transform_indices = @transform_6, window_bounds = array<i64: 1, 4, 8, 8>}, {transform_indices = @transform_7, window_bounds = array<i64: 1, 4, 8, 8>}]} {
    %c0 = arith.constant 0 : index
    %c0_0 = arith.constant 0 : index
    %c0_1 = arith.constant 0 : index
    %0 = vector.load %arg2[%c0, %c0_0, %c0_1] : memref<1x8x32xf32, #tpu.memory_space<vmem>>, vector<1x8x32xf32>
    %1 = vector.shape_cast %0 : vector<1x8x32xf32> to vector<8x32xf32>
    %c0_2 = arith.constant 0 : index
    %c0_3 = arith.constant 0 : index
    %2 = vector.load %arg3[%c0_2, %c0_3] : memref<1x32xf32, #tpu.memory_space<vmem>>, vector<1x32xf32>
    %3 = vector.shape_cast %2 : vector<1x32xf32> to vector<32xf32>
    %c0_4 = arith.constant 0 : index
    %c0_5 = arith.constant 0 : index
    %4 = vector.load %arg4[%c0_4, %c0_5] : memref<1x32xf32, #tpu.memory_space<vmem>>, vector<1x32xf32>
    %5 = vector.shape_cast %4 : vector<1x32xf32> to vector<32xf32>
    %cst = arith.constant dense<0.000000e+00> : vector<8xf32>
    %6 = vector.multi_reduction <add>, %1, %cst [1] : vector<8x32xf32> to vector<8xf32>
    %7 = vector.shape_cast %6 : vector<8xf32> to vector<8x1xf32>
    %cst_6 = arith.constant 3.200000e+01 : f32
    %8 = vector.broadcast %cst_6 : f32 to vector<8x1xf32>
    %9 = arith.divf %7, %8 : vector<8x1xf32>
    %10 = vector.broadcast %9 : vector<8x1xf32> to vector<8x32xf32>
    %11 = arith.subf %1, %10 : vector<8x32xf32>
    %12 = arith.mulf %11, %11 : vector<8x32xf32>
    %cst_7 = arith.constant dense<0.000000e+00> : vector<8xf32>
    %13 = vector.multi_reduction <add>, %12, %cst_7 [1] : vector<8x32xf32> to vector<8xf32>
    %14 = vector.shape_cast %13 : vector<8xf32> to vector<8x1xf32>
    %cst_8 = arith.constant 3.200000e+01 : f32
    %15 = vector.broadcast %cst_8 : f32 to vector<8x1xf32>
    %16 = arith.divf %14, %15 : vector<8x1xf32>
    %17 = vector.broadcast %9 : vector<8x1xf32> to vector<8x32xf32>
    %18 = arith.subf %1, %17 : vector<8x32xf32>
    %cst_9 = arith.constant 9.99999974E-6 : f32
    %19 = vector.broadcast %cst_9 : f32 to vector<8x1xf32>
    %20 = arith.addf %16, %19 : vector<8x1xf32>
    %21 = math.rsqrt %20 : vector<8x1xf32>
    %22 = vector.broadcast %21 : vector<8x1xf32> to vector<8x32xf32>
    %23 = arith.mulf %18, %22 : vector<8x32xf32>
    %24 = vector.shape_cast %3 : vector<32xf32> to vector<1x32xf32>
    %25 = vector.broadcast %24 : vector<1x32xf32> to vector<8x32xf32>
    %26 = arith.mulf %23, %25 : vector<8x32xf32>
    %27 = vector.shape_cast %5 : vector<32xf32> to vector<1x32xf32>
    %28 = vector.broadcast %27 : vector<1x32xf32> to vector<8x32xf32>
    %29 = arith.addf %26, %28 : vector<8x32xf32>
    %30 = arith.truncf %29 : vector<8x32xf32> to vector<8x32xbf16>
    %c0_10 = arith.constant 0 : index
    %c0_11 = arith.constant 0 : index
    %31 = vector.load %arg5[%c0_10, %c0_11] : memref<32x96xbf16, #tpu.memory_space<vmem>>, vector<32x96xbf16>
    %cst_12 = arith.constant dense<0.000000e+00> : vector<8x96xf32>
    %32 = tpu.matmul %30, %31, %cst_12 {dimension_numbers = #tpu.dot_dimension_numbers<[1], [0], [0], [1], [0, 0, 1, 1], [], []>} : vector<8x32xbf16>, vector<32x96xbf16>, vector<8x96xf32> -> vector<8x96xf32>
    %c0_13 = arith.constant 0 : index
    %c0_14 = arith.constant 0 : index
    %33 = vector.load %arg6[%c0_13, %c0_14] : memref<1x96xf32, #tpu.memory_space<vmem>>, vector<1x96xf32>
    %34 = vector.shape_cast %33 : vector<1x96xf32> to vector<96xf32>
    %35 = vector.shape_cast %34 : vector<96xf32> to vector<1x96xf32>
    %36 = vector.broadcast %35 : vector<1x96xf32> to vector<8x96xf32>
    %37 = arith.addf %32, %36 : vector<8x96xf32>
    %38 = arith.truncf %37 : vector<8x96xf32> to vector<8x96xbf16>
    %39 = vector.extract_strided_slice %38 {offsets = [0, 0], sizes = [8, 8], strides = [1, 1]} : vector<8x96xbf16> to vector<8x8xbf16>
    %c0_15 = arith.constant 0 : index
    %c0_16 = arith.constant 0 : index
    %c0_17 = arith.constant 0 : index
    %c0_18 = arith.constant 0 : index
    %40 = vector.load %arg7[%c0_15, %c0_16, %c0_17, %c0_18] : memref<1x4x8x8xbf16, #tpu.memory_space<vmem>>, vector<1x1x8x8xbf16>
    %41 = vector.shape_cast %40 : vector<1x1x8x8xbf16> to vector<8x8xbf16>
    %42 = vector.shape_cast %39 : vector<8x8xbf16> to vector<1x1x8x8xbf16>
    tpu.vector_store %arg7[%c0_15, %c0_16, %c0_17, %c0_18], %42 {strides = array<i32>} : memref<1x4x8x8xbf16, #tpu.memory_space<vmem>>, vector<1x1x8x8xbf16>,
    %43 = vector.extract_strided_slice %38 {offsets = [0, 32], sizes = [8, 8], strides = [1, 1]} : vector<8x96xbf16> to vector<8x8xbf16>
    %c0_19 = arith.constant 0 : index
    %c0_20 = arith.constant 0 : index
    %c0_21 = arith.constant 0 : index
    %c0_22 = arith.constant 0 : index
    %44 = vector.load %arg8[%c0_19, %c0_20, %c0_21, %c0_22] : memref<1x4x8x8xbf16, #tpu.memory_space<vmem>>, vector<1x1x8x8xbf16>
    %45 = vector.shape_cast %44 : vector<1x1x8x8xbf16> to vector<8x8xbf16>
    %46 = vector.shape_cast %43 : vector<8x8xbf16> to vector<1x1x8x8xbf16>
    tpu.vector_store %arg8[%c0_19, %c0_20, %c0_21, %c0_22], %46 {strides = array<i32>} : memref<1x4x8x8xbf16, #tpu.memory_space<vmem>>, vector<1x1x8x8xbf16>,
    %47 = vector.extract_strided_slice %38 {offsets = [0, 64], sizes = [8, 8], strides = [1, 1]} : vector<8x96xbf16> to vector<8x8xbf16>
    %c0_23 = arith.constant 0 : index
    %c0_24 = arith.constant 0 : index
    %c0_25 = arith.constant 0 : index
    %c0_26 = arith.constant 0 : index
    %48 = vector.load %arg9[%c0_23, %c0_24, %c0_25, %c0_26] : memref<1x4x8x8xbf16, #tpu.memory_space<vmem>>, vector<1x1x8x8xbf16>
    %49 = vector.shape_cast %48 : vector<1x1x8x8xbf16> to vector<8x8xbf16>
    %50 = vector.shape_cast %47 : vector<8x8xbf16> to vector<1x1x8x8xbf16>
    tpu.vector_store %arg9[%c0_23, %c0_24, %c0_25, %c0_26], %50 {strides = array<i32>} : memref<1x4x8x8xbf16, #tpu.memory_space<vmem>>, vector<1x1x8x8xbf16>,
    %51 = vector.extract_strided_slice %38 {offsets = [0, 8], sizes = [8, 8], strides = [1, 1]} : vector<8x96xbf16> to vector<8x8xbf16>
    %c0_27 = arith.constant 0 : index
    %c1 = arith.constant 1 : index
    %c0_28 = arith.constant 0 : index
    %c0_29 = arith.constant 0 : index
    %52 = vector.load %arg7[%c0_27, %c1, %c0_28, %c0_29] : memref<1x4x8x8xbf16, #tpu.memory_space<vmem>>, vector<1x1x8x8xbf16>
    %53 = vector.shape_cast %52 : vector<1x1x8x8xbf16> to vector<8x8xbf16>
    %54 = vector.shape_cast %51 : vector<8x8xbf16> to vector<1x1x8x8xbf16>
    tpu.vector_store %arg7[%c0_27, %c1, %c0_28, %c0_29], %54 {strides = array<i32>} : memref<1x4x8x8xbf16, #tpu.memory_space<vmem>>, vector<1x1x8x8xbf16>,
    %55 = vector.extract_strided_slice %38 {offsets = [0, 40], sizes = [8, 8], strides = [1, 1]} : vector<8x96xbf16> to vector<8x8xbf16>
    %c0_30 = arith.constant 0 : index
    %c1_31 = arith.constant 1 : index
    %c0_32 = arith.constant 0 : index
    %c0_33 = arith.constant 0 : index
    %56 = vector.load %arg8[%c0_30, %c1_31, %c0_32, %c0_33] : memref<1x4x8x8xbf16, #tpu.memory_space<vmem>>, vector<1x1x8x8xbf16>
    %57 = vector.shape_cast %56 : vector<1x1x8x8xbf16> to vector<8x8xbf16>
    %58 = vector.shape_cast %55 : vector<8x8xbf16> to vector<1x1x8x8xbf16>
    tpu.vector_store %arg8[%c0_30, %c1_31, %c0_32, %c0_33], %58 {strides = array<i32>} : memref<1x4x8x8xbf16, #tpu.memory_space<vmem>>, vector<1x1x8x8xbf16>,
    %59 = vector.extract_strided_slice %38 {offsets = [0, 72], sizes = [8, 8], strides = [1, 1]} : vector<8x96xbf16> to vector<8x8xbf16>
    %c0_34 = arith.constant 0 : index
    %c1_35 = arith.constant 1 : index
    %c0_36 = arith.constant 0 : index
    %c0_37 = arith.constant 0 : index
    %60 = vector.load %arg9[%c0_34, %c1_35, %c0_36, %c0_37] : memref<1x4x8x8xbf16, #tpu.memory_space<vmem>>, vector<1x1x8x8xbf16>
    %61 = vector.shape_cast %60 : vector<1x1x8x8xbf16> to vector<8x8xbf16>
    %62 = vector.shape_cast %59 : vector<8x8xbf16> to vector<1x1x8x8xbf16>
    tpu.vector_store %arg9[%c0_34, %c1_35, %c0_36, %c0_37], %62 {strides = array<i32>} : memref<1x4x8x8xbf16, #tpu.memory_space<vmem>>, vector<1x1x8x8xbf16>,
    %63 = vector.extract_strided_slice %38 {offsets = [0, 16], sizes = [8, 8], strides = [1, 1]} : vector<8x96xbf16> to vector<8x8xbf16>
    %c0_38 = arith.constant 0 : index
    %c2 = arith.constant 2 : index
    %c0_39 = arith.constant 0 : index
    %c0_40 = arith.constant 0 : index
    %64 = vector.load %arg7[%c0_38, %c2, %c0_39, %c0_40] : memref<1x4x8x8xbf16, #tpu.memory_space<vmem>>, vector<1x1x8x8xbf16>
    %65 = vector.shape_cast %64 : vector<1x1x8x8xbf16> to vector<8x8xbf16>
    %66 = vector.shape_cast %63 : vector<8x8xbf16> to vector<1x1x8x8xbf16>
    tpu.vector_store %arg7[%c0_38, %c2, %c0_39, %c0_40], %66 {strides = array<i32>} : memref<1x4x8x8xbf16, #tpu.memory_space<vmem>>, vector<1x1x8x8xbf16>,
    %67 = vector.extract_strided_slice %38 {offsets = [0, 48], sizes = [8, 8], strides = [1, 1]} : vector<8x96xbf16> to vector<8x8xbf16>
    %c0_41 = arith.constant 0 : index
    %c2_42 = arith.constant 2 : index
    %c0_43 = arith.constant 0 : index
    %c0_44 = arith.constant 0 : index
    %68 = vector.load %arg8[%c0_41, %c2_42, %c0_43, %c0_44] : memref<1x4x8x8xbf16, #tpu.memory_space<vmem>>, vector<1x1x8x8xbf16>
    %69 = vector.shape_cast %68 : vector<1x1x8x8xbf16> to vector<8x8xbf16>
    %70 = vector.shape_cast %67 : vector<8x8xbf16> to vector<1x1x8x8xbf16>
    tpu.vector_store %arg8[%c0_41, %c2_42, %c0_43, %c0_44], %70 {strides = array<i32>} : memref<1x4x8x8xbf16, #tpu.memory_space<vmem>>, vector<1x1x8x8xbf16>,
    %71 = vector.extract_strided_slice %38 {offsets = [0, 80], sizes = [8, 8], strides = [1, 1]} : vector<8x96xbf16> to vector<8x8xbf16>
    %c0_45 = arith.constant 0 : index
    %c2_46 = arith.constant 2 : index
    %c0_47 = arith.constant 0 : index
    %c0_48 = arith.constant 0 : index
    %72 = vector.load %arg9[%c0_45, %c2_46, %c0_47, %c0_48] : memref<1x4x8x8xbf16, #tpu.memory_space<vmem>>, vector<1x1x8x8xbf16>
    %73 = vector.shape_cast %72 : vector<1x1x8x8xbf16> to vector<8x8xbf16>
    %74 = vector.shape_cast %71 : vector<8x8xbf16> to vector<1x1x8x8xbf16>
    tpu.vector_store %arg9[%c0_45, %c2_46, %c0_47, %c0_48], %74 {strides = array<i32>} : memref<1x4x8x8xbf16, #tpu.memory_space<vmem>>, vector<1x1x8x8xbf16>,
    %75 = vector.extract_strided_slice %38 {offsets = [0, 24], sizes = [8, 8], strides = [1, 1]} : vector<8x96xbf16> to vector<8x8xbf16>
    %c0_49 = arith.constant 0 : index
    %c3 = arith.constant 3 : index
    %c0_50 = arith.constant 0 : index
    %c0_51 = arith.constant 0 : index
    %76 = vector.load %arg7[%c0_49, %c3, %c0_50, %c0_51] : memref<1x4x8x8xbf16, #tpu.memory_space<vmem>>, vector<1x1x8x8xbf16>
    %77 = vector.shape_cast %76 : vector<1x1x8x8xbf16> to vector<8x8xbf16>
    %78 = vector.shape_cast %75 : vector<8x8xbf16> to vector<1x1x8x8xbf16>
    tpu.vector_store %arg7[%c0_49, %c3, %c0_50, %c0_51], %78 {strides = array<i32>} : memref<1x4x8x8xbf16, #tpu.memory_space<vmem>>, vector<1x1x8x8xbf16>,
    %79 = vector.extract_strided_slice %38 {offsets = [0, 56], sizes = [8, 8], strides = [1, 1]} : vector<8x96xbf16> to vector<8x8xbf16>
    %c0_52 = arith.constant 0 : index
    %c3_53 = arith.constant 3 : index
    %c0_54 = arith.constant 0 : index
    %c0_55 = arith.constant 0 : index
    %80 = vector.load %arg8[%c0_52, %c3_53, %c0_54, %c0_55] : memref<1x4x8x8xbf16, #tpu.memory_space<vmem>>, vector<1x1x8x8xbf16>
    %81 = vector.shape_cast %80 : vector<1x1x8x8xbf16> to vector<8x8xbf16>
    %82 = vector.shape_cast %79 : vector<8x8xbf16> to vector<1x1x8x8xbf16>
    tpu.vector_store %arg8[%c0_52, %c3_53, %c0_54, %c0_55], %82 {strides = array<i32>} : memref<1x4x8x8xbf16, #tpu.memory_space<vmem>>, vector<1x1x8x8xbf16>,
    %83 = vector.extract_strided_slice %38 {offsets = [0, 88], sizes = [8, 8], strides = [1, 1]} : vector<8x96xbf16> to vector<8x8xbf16>
    %c0_56 = arith.constant 0 : index
    %c3_57 = arith.constant 3 : index
    %c0_58 = arith.constant 0 : index
    %c0_59 = arith.constant 0 : index
    %84 = vector.load %arg9[%c0_56, %c3_57, %c0_58, %c0_59] : memref<1x4x8x8xbf16, #tpu.memory_space<vmem>>, vector<1x1x8x8xbf16>
    %85 = vector.shape_cast %84 : vector<1x1x8x8xbf16> to vector<8x8xbf16>
    %86 = vector.shape_cast %83 : vector<8x8xbf16> to vector<1x1x8x8xbf16>
    tpu.vector_store %arg9[%c0_56, %c3_57, %c0_58, %c0_59], %86 {strides = array<i32>} : memref<1x4x8x8xbf16, #tpu.memory_space<vmem>>, vector<1x1x8x8xbf16>,
    return
  }
  func.func @transform_0(%arg0: i32, %arg1: i32) -> (i32, i32, i32) {
    %c0_i32 = arith.constant 0 : i32
    %c0_i32_0 = arith.constant 0 : i32
    return %arg0, %arg1, %c0_i32 : i32, i32, i32
  }
  func.func @transform_1(%arg0: i32, %arg1: i32) -> (i32, i32) {
    %c0_i32 = arith.constant 0 : i32
    %c0_i32_0 = arith.constant 0 : i32
    %c0_i32_1 = arith.constant 0 : i32
    return %c0_i32, %c0_i32_0 : i32, i32
  }
  func.func @transform_2(%arg0: i32, %arg1: i32) -> (i32, i32) {
    %c0_i32 = arith.constant 0 : i32
    %c0_i32_0 = arith.constant 0 : i32
    %c0_i32_1 = arith.constant 0 : i32
    return %c0_i32, %c0_i32_0 : i32, i32
  }
  func.func @transform_3(%arg0: i32, %arg1: i32) -> (i32, i32) {
    %c0_i32 = arith.constant 0 : i32
    %c0_i32_0 = arith.constant 0 : i32
    %c0_i32_1 = arith.constant 0 : i32
    return %c0_i32, %c0_i32_0 : i32, i32
  }
  func.func @transform_4(%arg0: i32, %arg1: i32) -> (i32, i32) {
    %c0_i32 = arith.constant 0 : i32
    %c0_i32_0 = arith.constant 0 : i32
    %c0_i32_1 = arith.constant 0 : i32
    return %c0_i32, %c0_i32_0 : i32, i32
  }
  func.func @transform_5(%arg0: i32, %arg1: i32) -> (i32, i32, i32, i32) {
    %c0_i32 = arith.constant 0 : i32
    %c0_i32_0 = arith.constant 0 : i32
    %c0_i32_1 = arith.constant 0 : i32
    return %arg0, %c0_i32, %arg1, %c0_i32_0 : i32, i32, i32, i32
  }
  func.func @transform_6(%arg0: i32, %arg1: i32) -> (i32, i32, i32, i32) {
    %c0_i32 = arith.constant 0 : i32
    %c0_i32_0 = arith.constant 0 : i32
    %c0_i32_1 = arith.constant 0 : i32
    return %arg0, %c0_i32, %arg1, %c0_i32_0 : i32, i32, i32, i32
  }
  func.func @transform_7(%arg0: i32, %arg1: i32) -> (i32, i32, i32, i32) {
    %c0_i32 = arith.constant 0 : i32
    %c0_i32_0 = arith.constant 0 : i32
    %c0_i32_1 = arith.constant 0 : i32
    return %arg0, %c0_i32, %arg1, %c0_i32_0 : i32, i32, i32, i32
  }
}

</mosaic_0001>

<bundles_post_ra>
// kernel: tpu_custom_call.1
= control target key start
LH: loop header
LB: loop body
LE: loop exit
PB: predicated region body
PF: predicated region fallthrough
CT: control target
= control target key end

     0   :  { %s1433_s0 = inlined_call_operand.hbm [shape: f32[2,8,32], index: 0, kind: input, shape index: {}]   ;;  %s1434_s1 = inlined_call_operand.hbm [shape: f32[1,32], index: 1, kind: input, shape index: {}]   ;;  %s1435_s2 = inlined_call_operand.vmem [shape: f32[1,32], index: 2, kind: input, shape index: {}]   ;;  %s1436_s3 = inlined_call_operand.hbm [shape: bf16[32,96], index: 3, kind: input, shape index: {}]   ;;  %s1437_s4 = inlined_call_operand.vmem [shape: f32[1,96], index: 4, kind: input, shape index: {}]   ;;  %s1438_s5 = inlined_call_operand.hbm [shape: bf16[2,4,8,8], index: 5, kind: output, shape index: {0}]   ;;  %s1439_s6 = inlined_call_operand.hbm [shape: bf16[2,4,8,8], index: 6, kind: output, shape index: {1}]   ;;  %s1440_s7 = inlined_call_operand.hbm [shape: bf16[2,4,8,8], index: 7, kind: output, shape index: {2}]  }
   0x1   :  { %1444 = sst [smem:[#allocation16_spill]] %s1433_s0 }
   0x2   :  { %1445 = sst [smem:[#allocation17_spill]] %s1434_s1 }
   0x3   :  { %1446 = sst [smem:[#allocation18_spill]] %s1435_s2 }
   0x4   :  { %1447 = sst [smem:[#allocation19_spill]] %s1436_s3 }
   0x5   :  { %13 = vsyncpa [#allocation3], 0 }
   0x6   :  { %15 = vsyncpa [#allocation3 + $0x1], 0 }
   0x7   :  { %16 = vsyncpa [#allocation6], 0 }
   0x8   :  { %17 = vsyncpa [#allocation4], 0 }
   0x9   :  { %19 = vsyncpa [#allocation4 + $0x1], 0 }
   0xa   :  { %20 = vsyncpa [#allocation10], 0 }
   0xb   :  { %22 = vsyncpa [#allocation10 + $0x1], 0  ;;  %s1194_s24 = smov 0   ;;  %s1196_s25 = smov 0  }
   0xc   :  { %s1198_s26 = smov 0   ;;  %s1200_s27 = smov 0  }
   0xd   :  { %s1202_s28 = smov 0   ;;  %s1204_s29 = smov 0  }
   0xe LB: > { %s1225_s30 = sadd.s32 4294967295, %s1135_s29   ;;  %s1441_s8 = sadd.s32 4294967294, %s1135_s29   ;;  %s1135_s29 = sphi %s1204_s29, %s28_s29   ;;  %s1131_s28 = sphi %s1202_s28, %s1462_s28   ;;  %s1127_s27 = sphi %s1200_s27, %s1461_s27   ;;  %s1123_s26 = sphi %s1198_s26, %s1460_s26   ;;  %s1119_s25 = sphi %s1196_s25, %s1459_s25   ;;  %s1115_s24 = sphi %s1194_s24, %s1458_s24  }
   0xf   : > { %p62_p0 = scmp.ne.s32.totalorder %s1119_s25, %s1115_s24  ;;  %p63_p1 = scmp.eq.s32.totalorder %s1225_s30, 0 }
  0x10   : > { %p178_p2 = scmp.eq.s32.totalorder %s1441_s8, 1  ;;  %p737_p4 = scmp.ge.s32.totalorder %s1135_s29, 1 }
  0x11   : > { %p1235_p3 = por %p63_p1, %p62_p0  ;;  %p241_p6 = scmp.lt.s32.totalorder %s1135_s29, 3 }
  0x12   : > { %p1240_p5 = por %p178_p2, %p62_p0  ;;  %s1450_s1 = sld [smem:[#allocation17_spill]] }
  0x13   : > { %p1248_p7 = pnand %p737_p4, %p241_p6  ;;  %p740_p8 = scmp.ge.s32.totalorder %s1135_s29, 2 }
  0x14   : > { %s1137_s15 = smov [#allocation5]   ;;  %s1452_s3 = sld [smem:[#allocation19_spill]] }
  0x15   : > { %p800_p9 = pneg %p1248_p7  ;;  %s255_s16 = sshll.u32 %s1137_s15, 4  ;;  %s256_s16 = int_to_ptr.vmem [resolvable:$true] %s255_s16 }
  0x16   : > { %s1138_s20 = smov [#allocation7]   ;;  %s1139_s22 = smov 64  }
  0x17   : > { %p801_p10 = pnand %p800_p9, %p63_p1  ;;  %s269_s21 = sshll.u32 %s1138_s20, 4  ;;  %s270_s21 = int_to_ptr.vmem [resolvable:$true] %s269_s21 }
  0x18   : > { %s253_s13 = sshll.u32 %s1450_s1, 4  ;;  %s1140_s23 = smov 4   ;;  %s254_s13 = int_to_ptr.hbm [resolvable:$true] %s253_s13 }
  0x19   : > { %803 = dma.hbm_to_vmem [thread:$0]  (!%p801_p10), %s254_s13, 16, %s256_s16, [#allocation6]  }
  0x1a   : > { %s267_s19 = sshll.u32 %s1452_s3, 4  ;;  %p172_p11 = scmp.eq.s32.totalorder %s1225_s30, 1  ;;  %s268_s19 = int_to_ptr.hbm [resolvable:$true] %s267_s19 }
  0x1b   : > { %806 = dma.hbm_to_vmem [thread:$0]  (!%p801_p10), %s268_s19, 256, %s270_s21, [#allocation6], %s1139_s22, %s1139_s22, %s1140_s23  }
  0x1c   : > { %s40_s11 = sadd.s32 1, %s1131_s28  ;;  %s49_s12 = sadd.s32 1, %s1123_s26 }
  0x1d   : > { %p42_p12 = scmp.ge.s32.totalorder %s40_s11, 2  ;;  %p56_p13 = scmp.ne.s32.totalorder %s1123_s26, %s1119_s25 }
  0x1e   : > { %p57_p0 = scmp.eq.s32.totalorder %s1135_s29, 0  ;;  %p823_p4 = scmp.lt.s32.totalorder %s1135_s29, 2 }
  0x1f   : > { %s1464_s11 = smov (%p42_p12, %s40_s11), 0  ;;  %p1268_p2 = por %p172_p11, %p56_p13 }
  0x20   : > { %s44_s13 = ssub.s32 %s1131_s28, %s1464_s11  ;;  %s286_s16 = sand.u32 1, %s1123_s26  }
  0x21   : > { %p47_p6 = scmp.eq.s32.totalorder %s44_s13, 0  ;;  %p58_p9 = por %p57_p0, %p56_p13 }
  0x22   : > { %s741_s17 = sshll.u32 %s286_s16, 3  ;;  %s742_s18 = sshll.u32 %s1131_s28, 3 }
  0x23   : > { %s1278_s19 = scalar_select %p47_p6, %s1123_s26, %s49_s12  }
  0x24   : > { %s1454_s0 = sld [smem:[#allocation16_spill]]  ;;  %s290_s8 = scalar_lea.vmem [#allocation2], %s741_s17 }
  0x25   : > { %s299_s1 = sshll.u32 %s290_s8, 4  ;;  %p808_p10 = pnand %p823_p4, %p58_p9  ;;  %s300_s1 = int_to_ptr.vmem [resolvable:$true] %s299_s1 }
  0x26   : > { %s287_s3 = scalar_lea.sflag [#allocation3], %s286_s16  ;;  %s1288_s12 = sand.u32 (!%p1248_p7), 1, %s1119_s25  }
  0x27   : > { %s744_s13 = sshll.u32 (!%p1248_p7), %s1288_s12, 3 }
  0x28   : > { %308 = sbr.rel (%p1248_p7) target bundleno = 608 (0x260), region = 40  ;;  %s314_s20 = scalar_lea.vmem (!%p1248_p7), [#allocation2], %s744_s13 }
  0x2a   : > { %s295_s22 = scalar_lea.hbm %s1454_s0, %s742_s18  ;;  %s311_s18 = scalar_lea.sflag (!%p1248_p7), [#allocation3], %s1288_s12 }
  0x2b   : > { %s297_s23 = sshll.u32 %s295_s22, 4  ;;  %s298_s23 = int_to_ptr.hbm [resolvable:$true] %s297_s23 }
  0x2c   : > { %810 = dma.hbm_to_vmem [thread:$0]  (!%p808_p10), %s298_s23, 128, %s300_s1, %s287_s3  }
  0x2d   : > { %1098 = dma.done.wait (%p1235_p3), %s311_s18, 128  }
  0x2e   : > { %1100 = vsyncadd (%p1235_p3), %s311_s18, 4294967168 }
  0x2f   : > { %1102 = dma.done.wait (%p63_p1), [#allocation6], 272  }
  0x30   : > { %1104 = vsyncadd (%p63_p1), [#allocation6], 4294967024  ;;  %vm370_vm0 = vcmask 261120   ;;  %v367_v0 = vld [vmem:[%s314_s20] sm:$0xff]  ;;  %v1141_v2 = vmov 32.0   ;;  %v779_v15 = vld [vmem:[#allocation7] sm:$0xff] }
  0x31   : > { %v371_v1 = vsel %vm370_vm0, %v367_v0, 0.0  ;;  %895 = vrcp.f32 %v1141_v2  ;;  %v780_v14 = vld [vmem:[#allocation7 + $0x8] sm:$0xff]  ;;  %v892_v25 = vld [vmem:[#allocation5] ss:$0 sm:$0xff]  ;;  %s1455_s2 = sld [smem:[#allocation18_spill]]  ;;  %s1310_s14 = sshll.u32 %s1288_s12, 4 }
  0x32   : > { %372 = vadd.xlane.f32.xlu0 %v371_v1  ;;  %438 = vmatpush.bf16.msra.mxu0 %v780_v14  ;;  %v894_v32 = vld [vmem:[%s1437_s4] ss:$0 sm:$0xff]  ;;  %vm446_vm5 = vcmask 60416   ;;  %s1442_s16 = smov 64   ;;  %s1143_s17 = smov 80  }
  0x33   : > { %s1314_s21 = scalar_lea.vmem [#allocation8], %s1310_s14  ;;  %s1144_s22 = smov 96  }
  0x34   : > { %s1145_s23 = smov 72   ;;  %s1146_s13 = smov 88  }
  0x35   : > { %s1147_s18 = smov 56   ;;  %s1148_s20 = smov 120  }
  0x36   : > { %439 = vmatpush.bf16.msra.mxu0 %v779_v15  ;;  %s1149_s1 = smov 48   ;;  %s1150_s3 = smov 112  }
  0x37   : > { %v896_v3 = vpop.eup %895  ;;  %v893_v28 = vld [vmem:[%s1455_s2] ss:$0 sm:$0xff]  ;;  %s1151_s8 = smov 40   ;;  %s1152_s9 = smov 104  }
  0x38   : > { %v375_v4 = vmul.f32 32.0, %v896_v3  ;;  %vm379_vm1 = vweird.f32 %v896_v3 }
  0x3a   : > { %v376_v5 = vsub.f32 1.0, %v375_v4 }
  0x3c   : > { %v377_v6 = vmul.f32 %v896_v3, %v376_v5 }
  0x3e   : > { %v378_v7 = vadd.f32 %v896_v3, %v377_v6 }
  0x40   : > { %v380_v8 = vsel %vm379_vm1, %v896_v3, %v378_v7 }
  0xa5   : > { %v373_v9 = vpop.xlane.xlu0 %372 }
  0xa6   : > { %v381_v10 = vmul.f32 %v380_v8, %v373_v9 }
  0xa8   : > { %v382_v11 = vsub.f32 %v367_v0, %v381_v10 }
  0xaa   : > { %v383_v12 = vmul.f32 %v382_v11, %v382_v11 }
  0xac   : > { %v384_v13 = vsel %vm370_vm0, %v383_v12, 0.0 }
  0xad   : > { %385 = vadd.xlane.f32.xlu0 %v384_v13 }
 0x120   : > { %v386_v16 = vpop.xlane.xlu0 %385 }
 0x121   : > { %v387_v17 = vmul.f32 %v386_v16, %v380_v8 }
 0x123   : > { %v388_v18 = vadd.f32 1e-05, %v387_v17 }
 0x125   : > { %897 = vrsqrt.f32 %v388_v18  ;;  %vm395_vm3 = vweird.f32 %v388_v18 }
 0x12b   : > { %v898_v19 = vpop.eup %897 }
 0x12c   : > { %v390_v20 = vmul.f32 %v898_v19, %v388_v18  ;;  %vm396_vm2 = vweird.f32 %v898_v19 }
 0x12d   : > { %vm397_vm4 = vmor %vm395_vm3, %vm396_vm2 }
 0x12e   : > { %v391_v21 = vmul.f32 %v898_v19, %v390_v20 }
 0x130   : > { %v392_v22 = vmul.f32 0.5, %v391_v21 }
 0x132   : > { %v393_v23 = vsub.f32 1.5, %v392_v22 }
 0x134   : > { %v394_v24 = vmul.f32 %v898_v19, %v393_v23 }
 0x136   : > { %v398_v26 = vsel %vm397_vm4, %v898_v19, %v394_v24 }
 0x137   : > { %v399_v27 = vmul.f32 %v398_v26, %v382_v11 }
 0x139   : > { %v403_v29 = vmul.f32 %v892_v25, %v399_v27 }
 0x13b   : > { %v407_v30 = vadd.f32 %v893_v28, %v403_v29 }
 0x13d   : > { %v408_v31 = vpack.c.bf16 %v407_v30, %v407_v30 }
 0x13f   : > { %758 = vmatmul.msk.bf16.vlgmr.msra.gmra.mxu0 %vm370_vm0, %v408_v31 }
 0x1bc   : > { %v441_v33 = vpop.f32.mrf.mxu0 }
 0x1bd   : > { %v442_v34 = vadd.f32 %v894_v32, %v441_v33 }
 0x1bf   : > { %v445_v35 = vpack.c.bf16 %v442_v34, %v442_v34 }
 0x1c1   : > { %453 = vrot.lane.b32.xlu0 %v445_v35, %s1442_s16  ;;  %477 = vrot.lane.b32.xlu2 %v445_v35, %s1143_s17  ;;  %447 = vst.msk [vmem:[%s1314_s21] sm:$0xf] %vm446_vm5, %v445_v35  ;;  %s358_s17 = scalar_lea.vmem [#allocation9], %s1310_s14 }
 0x1c2   : > { %449 = vrot.lane.b32.xlu1 %v445_v35, %s1144_s22  ;;  %s365_s22 = scalar_lea.vmem [#allocation11], %s1310_s14 }
 0x1c3   : > { %s562_s16 = sshll.u32 %s365_s22, 4  ;;  %s1343_s16 = int_to_ptr.vmem [resolvable:$true] %s562_s16 }
 0x1c4   : > { %v443_v36 = vpop.f32.mrf.mxu0 }
 0x1c9   : > { %492 = vrot.lane.b32.xlu2 %v445_v35, %s1145_s23  ;;  %s1324_s23 = sshll.u32 %s1127_s27, 4 }
 0x1ca   : > { %462 = vrot.lane.b32.xlu1 %v445_v35, %s1146_s13  ;;  %s561_s27 = scalar_lea.hbm %s1440_s7, %s1324_s23 }
 0x1cb   : > { %s1340_s0 = sshll.u32 %s561_s27, 4  ;;  %s565_s0 = int_to_ptr.hbm [resolvable:$true] %s1340_s0 }
 0x1d1   : > { %467 = vrot.lane.b32.xlu2 %v445_v35, %s1147_s18 }
 0x1d2   : > { %457 = vrot.lane.b32.xlu1 %v445_v35, %s1148_s20  ;;  %s543_s20 = scalar_lea.hbm %s1439_s6, %s1324_s23 }
 0x1d9   : > { %482 = vrot.lane.b32.xlu2 %v445_v35, %s1149_s1  ;;  %s1009_s1 = scalar_lea.hbm %s1439_s6, 32 }
 0x1da   : > { %472 = vrot.lane.b32.xlu1 %v445_v35, %s1150_s3  ;;  %s544_s3 = sshll.u32 %s358_s17, 4  ;;  %s545_s3 = int_to_ptr.vmem [resolvable:$true] %s544_s3 }
 0x1e1   : > { %497 = vrot.lane.b32.xlu2 %v445_v35, %s1151_s8  ;;  %s507_s8 = sand.u32 1, %s1225_s30  }
 0x1e2   : > { %487 = vrot.lane.b32.xlu1 %v445_v35, %s1152_s9  ;;  %s1338_s9 = sshll.u32 %s543_s20, 4  ;;  %s1348_s30 = scalar_lea.sflag [#allocation10], %s507_s8  ;;  %s547_s9 = int_to_ptr.hbm [resolvable:$true] %s1338_s9 }
 0x1e3   : > { %s1003_s13 = sshra.s32 %s547_s9, 4  ;;  %s1004_s13 = int_to_ptr.hbm [resolvable:$true] %s1003_s13 }
 0x1e4   : > { %s1005_s18 = scalar_lea.hbm %s1004_s13, 16  ;;  %p1010_p11 = scmp.lt.s32.totalorder %s1004_s13, %s1439_s6 }
 0x1e5   : > { %p1006_p1 = scmp.ne.s32.totalorder %s1004_s13, %s1005_s18  ;;  %p1011_p12 = scmp.lt.s32.totalorder %s1009_s1, %s1005_s18 }
 0x1e7   : > { %p1007_p3 = pnand %p1006_p1, %p1268_p2  ;;  %p1012_p13 = por %p1011_p12, %p1010_p11 }
 0x1e9   : > { %p1008_p7 = pneg %p1007_p3 }
 0x1eb   : > { %p1013_p0 = pnand %p1012_p13, %p1008_p7 }
 0x21b   : > { %v478_v37 = vpop.permute.xlu2 %477 }
 0x21c   : > { %763 = vst.msk [vmem:[%s358_s17 + $0x8] sm:$0xf] %vm446_vm5, %v478_v37 }
 0x223   : > { %v493_v38 = vpop.permute.xlu2 %492 }
 0x224   : > { %766 = vst.msk [vmem:[%s358_s17 + $0xc] sm:$0xf] %vm446_vm5, %v493_v38 }
 0x22b   : > { %v468_v39 = vpop.permute.xlu2 %467 }
 0x22c   : > { %761 = vst.msk [vmem:[%s365_s22 + $0x4] sm:$0xf] %vm446_vm5, %v468_v39 }
 0x233   : > { %v454_v40 = vpop.permute.xlu0 %453  ;;  %v483_v41 = vpop.permute.xlu2 %482 }
 0x234   : > { %456 = vst.msk [vmem:[%s365_s22] sm:$0xf] %vm446_vm5, %v454_v40  ;;  %v450_v42 = vpop.permute.xlu1 %449 }
 0x235   : > { %764 = vst.msk [vmem:[%s365_s22 + $0x8] sm:$0xf] %vm446_vm5, %v483_v41 }
 0x236   : > { %452 = vst.msk [vmem:[%s358_s17] sm:$0xf] %vm446_vm5, %v450_v42 }
 0x23b   : > { %v498_v43 = vpop.permute.xlu2 %497 }
 0x23c   : > { %767 = vst.msk [vmem:[%s365_s22 + $0xc] sm:$0xf] %vm446_vm5, %v498_v43  ;;  %v463_v44 = vpop.permute.xlu1 %462 }
 0x23d   : > { %760 = vst.msk [vmem:[%s358_s17 + $0x4] sm:$0xf] %vm446_vm5, %v463_v44 }
 0x23e   : > { %1016 = shalt.err (!%p1013_p0)
}
 0x23f   : > { %s1153_s17 = smov 4   ;;  %s1456_s22 = smov 64  }
 0x240   : > { %795 = dma.vmem_to_hbm [thread:$0]  (%p1268_p2), %s545_s3, 256, %s547_s9, %s1348_s30, %s1456_s22, %s1456_s22, %s1153_s17  }
 0x241   : > { %s1031_s8 = sshra.s32 %s565_s0, 4  ;;  %s1037_s18 = scalar_lea.hbm %s1440_s7, 32  ;;  %s1032_s8 = int_to_ptr.hbm [resolvable:$true] %s1031_s8 }
 0x242   : > { %s1033_s20 = scalar_lea.hbm %s1032_s8, 16  ;;  %p1038_p10 = scmp.lt.s32.totalorder %s1032_s8, %s1440_s7 }
 0x243   : > { %p1034_p4 = scmp.ne.s32.totalorder %s1032_s8, %s1033_s20  ;;  %p1039_p1 = scmp.lt.s32.totalorder %s1037_s18, %s1033_s20 }
 0x245   : > { %p1035_p6 = pnand %p1034_p4, %p1268_p2  ;;  %p1040_p3 = por %p1039_p1, %p1038_p10 }
 0x247   : > { %p1036_p9 = pneg %p1035_p6 }
 0x249   : > { %p1041_p7 = pnand %p1040_p3, %p1036_p9 }
 0x24b   : > { %1044 = shalt.err (!%p1041_p7)
}
 0x24c   : > { %796 = dma.vmem_to_hbm [thread:$0]  (%p1268_p2), %s1343_s16, 256, %s565_s0, %s1348_s30, %s1456_s22, %s1456_s22, %s1153_s17   ;;  %v458_v45 = vpop.permute.xlu1 %457 }
 0x24d   : > { %759 = vst.msk [vmem:[%s1314_s21 + $0x4] sm:$0xf] %vm446_vm5, %v458_v45  ;;  %s525_s27 = scalar_lea.hbm %s1438_s5, %s1324_s23  ;;  %s526_s8 = sshll.u32 %s1314_s21, 4  ;;  %s527_s8 = int_to_ptr.vmem [resolvable:$true] %s526_s8 }
 0x24e   : > { %s528_s20 = sshll.u32 %s525_s27, 4  ;;  %s503_s2 = scalar_lea.sflag [#allocation4], %s1288_s12  ;;  %s529_s20 = int_to_ptr.hbm [resolvable:$true] %s528_s20 }
 0x24f   : > { %s1059_s0 = sshra.s32 %s529_s20, 4  ;;  %s1065_s18 = scalar_lea.hbm %s1438_s5, 32  ;;  %s1060_s0 = int_to_ptr.hbm [resolvable:$true] %s1059_s0 }
 0x250   : > { %s1061_s16 = scalar_lea.hbm %s1060_s0, 16  ;;  %p1066_p0 = scmp.lt.s32.totalorder %s1060_s0, %s1438_s5 }
 0x251   : > { %p1062_p11 = scmp.ne.s32.totalorder %s1060_s0, %s1061_s16  ;;  %p1067_p4 = scmp.lt.s32.totalorder %s1065_s18, %s1061_s16 }
 0x253   : > { %p1063_p12 = pnand %p1062_p11, %p1268_p2  ;;  %p1068_p6 = por %p1067_p4, %p1066_p0 }
 0x254   : > { %v473_v46 = vpop.permute.xlu1 %472 }
 0x255   : > { %762 = vst.msk [vmem:[%s1314_s21 + $0x8] sm:$0xf] %vm446_vm5, %v473_v46  ;;  %p1064_p13 = pneg %p1063_p12 }
 0x257   : > { %p1069_p9 = pnand %p1068_p6, %p1064_p13 }
 0x25c   : > { %v488_v47 = vpop.permute.xlu1 %487 }
 0x25d   : > { %765 = vst.msk [vmem:[%s1314_s21 + $0xc] sm:$0xf] %vm446_vm5, %v488_v47 }
 0x25e   : > { %1072 = shalt.err (!%p1069_p9)
}
 0x25f   : > { %794 = dma.vmem_to_hbm [thread:$0]  (%p1268_p2), %s527_s8, 256, %s529_s20, %s503_s2, %s1456_s22, %s1456_s22, %s1153_s17  }
 0x260 PF: > { %s579_s12 = sand.u32 1, %s1115_s24   ;;  %p812_p10 = pnand %p740_p8, %p1240_p5 }
 0x261   : > { %s580_s21 = scalar_lea.sflag [#allocation4], %s579_s12 }
 0x262   : > { %p813_p1 = pneg %p812_p10 }
 0x264   : > { %1106 = dma.done.wait (%p813_p1), %s580_s21, 256  }
 0x265   : > { %1108 = vsyncadd (%p813_p1), %s580_s21, 4294967040  ;;  %s1457_s1 = sadd.s32 4294967294, %s1135_s29  }
 0x266   : > { %s589_s3 = sand.u32 1, %s1457_s1  }
 0x267   : > { %s590_s15 = scalar_lea.sflag [#allocation10], %s589_s3 }
 0x268   : > { %1110 = dma.done.wait (%p813_p1), %s590_s15, 512  }
 0x269   : > { %1112 = vsyncadd (%p813_p1), %s590_s15, 4294966784  ;;  %s28_s29 = sadd.s32 1, %s1135_s29   ;;  %s1458_s24 = smov %s1119_s25 }
 0x26a   : > { %p25_p2 = scmp.ge.s32.totalorder %s28_s29, 4   ;;  %s1459_s25 = smov %s1123_s26 }
 0x26b   : > { %s1460_s26 = smov %s1278_s19  ;;  %s1461_s27 = smov %s1131_s28 }
 0x26c   : > { %s1462_s28 = smov %s1464_s11  ;;  %27 = sbr.rel (!%p25_p2) target bundleno = 14 (0xe), region = 134 }
 0x271   :  { %606 = vsyncpa [#allocation3], 1 }
 0x272   :  { %608 = vsyncpa [#allocation3 + $0x1], 1 }
 0x273   :  { %609 = vsyncpa [#allocation6], 1 }
 0x274   :  { %610 = vsyncpa [#allocation4], 1 }
 0x275   :  { %612 = vsyncpa [#allocation4 + $0x1], 1 }
 0x276   :  { %613 = vsyncpa [#allocation10], 1 }
 0x277   :  { %615 = vsyncpa [#allocation10 + $0x1], 1 }

</bundles_post_ra>
